<compile_context>
chip_gen: v6e
topology: v6e:2x2x1
jax: 0.10.0
libtpu: 0.0.40
codegen_flags: <defaults>
</compile_context>

<pallas_src>
import functools

import jax
import jax.numpy as jnp
from jax.experimental import pallas as pl
from jax.experimental.pallas import tpu as pltpu

CNN_DIM = 512   # resnet18 penultimate feature size
LANE = 128      # TPU lane width


def _round_up(x, m):
    return (x + m - 1) // m * m


def _row_align(itemsize):
    # Sublane packing granularity: 8 rows (f32), 16 rows (bf16), 32 rows (int8).
    return max(8, (8 * 4) // itemsize)


def _vmem_plan():
    """Generation-aware VMEM sizing: per-buffer image-tile budget and scoped
    VMEM limit derived from physical VMEM (128 MiB v5e/v6e, 64 MiB/TC v7x).
    Falls back to conservative v7x numbers if the query fails."""
    cap = None
    try:
        cap = getattr(pltpu.get_tpu_info(), "vmem_capacity_bytes", None)
    except Exception:
        cap = None
    if not cap:
        cap = 64 * 1024 * 1024
    budget = cap // 8                                  # per image buffer
    vmem_limit = min(cap * 3 // 4, 96 * 1024 * 1024)   # 96 MiB v5e/v6e, 48 MiB v7x
    return int(budget), int(vmem_limit)


def _choose_batch_tile(B, C, S, itemsize, budget_bytes):
    """Largest batch tile whose full-spatial image tile fits the per-buffer
    budget, subject to: tb divides B, tb is sublane-legal for the state/output
    blocks, tb*C is pack-aligned for the image rows (16 for bf16), and — when
    possible — at least two batch tiles remain so the 'parallel' grid axis can
    shard across both v7x TensorCores."""
    align = _row_align(itemsize)
    cands = []
    for t in range(1, B + 1):
        if B % t:
            continue
        rows_ok = (t * C) % align == 0 or t == B
        sub_ok = t % 8 == 0 or t == B
        if rows_ok and sub_ok:
            cands.append(t)
    if not cands:
        cands = [B]
    fitting = [t for t in cands if t * C * S * itemsize <= budget_bytes]
    if not fitting:
        fitting = [min(cands)]
    multi = [t for t in fitting if B // t >= 2]
    return max(multi) if multi else max(fitting)


def _choose_spatial_tile(S, rows, itemsize, budget_bytes):
    """Tile the spatial (reduction) axis only when a full-S row block exceeds
    the budget; full-S tiles keep the dominant DMA fully contiguous (matters
    most on v5e's lower HBM bandwidth)."""
    if rows * S * itemsize <= budget_bytes or S <= LANE:
        return S
    if rows % _row_align(itemsize) != 0:
        return S   # cannot legally tile the lane axis with unaligned rows
    fitting = [t for t in range(LANE, S, LANE)
               if S % t == 0 and rows * t * itemsize <= budget_bytes]
    return max(fitting) if fitting else S


def _make_kernel(ts):
    n_full = ts // LANE     # full 128-lane groups per spatial tile
    rem = ts % LANE

    def kernel(img_ref, state_ref, sel_ref, wimg_ref,
               w1_ref, b1_ref, w2i_ref, w2s_ref, b2_ref, w3_ref, b3_ref,
               out_ref, acc_ref):
        s = pl.program_id(1)

        @pl.when(s == 0)
        def _():
            acc_ref[...] = jnp.zeros_like(acc_ref)

        # ---- spatial partial sum (hot loop) ----
        # Lane-blocked f32 accumulation: per-step work is VPU casts/adds only;
        # the single cross-lane (XLU) reduce is deferred to the finalize step.
        # (v6e/v7x could do the first add level in bf16 if VALU ever saturates;
        # kept f32 so the same kernel is exact and v5e-safe.)
        tile = img_ref[...]                                       # [TB*C, ts]
        if n_full > 0:
            psum = tile[:, 0:LANE].astype(jnp.float32)
            for g in range(1, n_full):
                psum = psum + tile[:, g * LANE:(g + 1) * LANE].astype(jnp.float32)
            acc_ref[...] += psum
        if rem > 0:
            tail = jnp.sum(tile[:, n_full * LANE:].astype(jnp.float32),
                           axis=-1, keepdims=True)
            acc_ref[:, 0:1] += tail

        @pl.when(s == pl.num_programs(1) - 1)
        def _():
            # ---- cnn_encoder stand-in: global average pool (1/S folded into
            #      wimg_rep by the wrapper) + linear projection to 512-d. ----
            # TODO(synk): the pretrained resnet18 conv/BN body is not
            #             translated; only its pool + linear projection is fused.
            pooled = jnp.sum(acc_ref[...], axis=-1, keepdims=True)   # [TB*C, 1]
            weighted = pooled * wimg_ref[...]                         # [TB*C, 512]
            img_embed = jnp.dot(sel_ref[...], weighted,
                                preferred_element_type=jnp.float32)   # [TB, 512]

            # ---- obs_encoder: Linear(obs_dim, hidden) -> Identity -> ReLU ----
            state_embed = jnp.maximum(
                jnp.dot(state_ref[...], w1_ref[...],
                        preferred_element_type=jnp.float32) + b1_ref[...], 0.0)

            # ---- act head; concat realized via split weight rows ----
            h = jnp.maximum(
                jnp.dot(img_embed, w2i_ref[...], preferred_element_type=jnp.float32)
                + jnp.dot(state_embed, w2s_ref[...], preferred_element_type=jnp.float32)
                + b2_ref[...], 0.0)

            out = jnp.tanh(
                jnp.dot(h, w3_ref[...], preferred_element_type=jnp.float32)
                + b3_ref[...])
            out_ref[...] = out.astype(out_ref.dtype)

    return kernel


def prepare_kernel_params(params):
    """One-time prep: pad linear layers to lane-dense (multiple-of-128) dims.
    The 1/S of the average pool is NOT baked here — the wrapper folds it from
    the actual spatial size of each call."""
    obs_dim, hidden = params["w1"].shape
    act_dim = params["w3"].shape[1]
    op = _round_up(obs_dim, LANE)
    hp = _round_up(hidden, LANE)
    ap = _round_up(act_dim, LANE)

    def pad_to(x, rows=None, cols=None):
        r = 0 if rows is None else rows - x.shape[0]
        c = 0 if cols is None else cols - x.shape[1]
        return jnp.pad(x, ((0, r), (0, c)))

    return {
        "wimg": params["wimg"].astype(jnp.float32),
        "w1": pad_to(params["w1"], rows=op, cols=hp),
        "b1": pad_to(params["b1"], cols=hp),
        "w2_img": pad_to(params["w2_img"], cols=hp),
        "w2_state": pad_to(params["w2_state"], rows=hp, cols=hp),
        "b2": pad_to(params["b2"], cols=hp),
        "w3": pad_to(params["w3"], rows=hp, cols=ap),
        "b3": pad_to(params["b3"], cols=ap),
    }


@functools.partial(jax.jit,
                   static_argnames=("act_dim", "tb", "ts", "vmem_limit"))
def _vismlp_forward(img, state_obs, kparams, *, act_dim, tb, ts, vmem_limit):
    B, C, H, W = img.shape
    S = H * W
    itemsize = jnp.dtype(img.dtype).itemsize
    obs_dim = state_obs.shape[1]
    op = kparams["w1"].shape[0]
    hp = kparams["w1"].shape[1]
    ap = kparams["w3"].shape[1]

    assert B % tb == 0 and (tb == B or tb % 8 == 0), (B, tb)
    assert S % ts == 0 and (ts == S or ts % LANE == 0), (S, ts)

    # Dense sublane layout: [B, C, H, W] -> [B*C, S] is a free row-major view.
    imgf = img.reshape(B * C, S)
    # obs_dim padded to a full 128-lane group: removes masked lane loads and
    # the K=obs_dim partial MXU pass (padding cols/rows are exact zeros).
    state_p = jnp.pad(state_obs.astype(jnp.float32), ((0, 0), (0, op - obs_dim)))

    # Tiny per-tile constants for the pool->projection contraction:
    #   sel[b, b*C + c] = 1 sums the C channel rows of each batch row,
    #   wimg_rep[b*C + c, :] = wimg[c, :] / S  (1/S from the actual img shape).
    sel = jnp.kron(jnp.eye(tb, dtype=jnp.float32), jnp.ones((1, C), jnp.float32))
    wimg_rep = jnp.tile(kparams["wimg"], (tb, 1)) * (1.0 / S)

    const = lambda i, s: (0, 0)
    img_spec_kwargs = {}
    if S // ts >= 3:
        # Deeper pipelining to hide DMA jitter across many spatial tiles
        # (third buffer is accounted for by the per-buffer budget).
        img_spec_kwargs["pipeline_mode"] = pl.Buffered(3)
    in_specs = [
        pl.BlockSpec((tb * C, ts), lambda i, s: (i, s), **img_spec_kwargs),
        pl.BlockSpec((tb, op), lambda i, s: (i, 0)),     # state: batch-tiled
        pl.BlockSpec((tb, tb * C), const),               # weights: VMEM-resident
        pl.BlockSpec((tb * C, CNN_DIM), const),
        pl.BlockSpec((op, hp), const),
        pl.BlockSpec((1, hp), const),
        pl.BlockSpec((CNN_DIM, hp), const),
        pl.BlockSpec((hp, hp), const),
        pl.BlockSpec((1, hp), const),
        pl.BlockSpec((hp, ap), const),
        pl.BlockSpec((1, ap), const),
    ]

    # Advisory cost: HBM-DMA dominated by the image read; small finalize MLPs.
    n_bt = B // tb
    mm_flops = 2 * tb * ((tb * C) * CNN_DIM + op * hp + CNN_DIM * hp
                         + hp * hp + hp * ap) * n_bt
    weight_bytes = 4 * (tb * tb * C + tb * C * CNN_DIM + op * hp + hp
                        + CNN_DIM * hp + hp * hp + hp + hp * ap + ap)
    cost = pl.CostEstimate(
        flops=int(B * C * S + mm_flops),
        transcendentals=int(B * ap),
        bytes_accessed=int(B * C * S * itemsize + B * op * 4
                           + weight_bytes + B * ap * 4),
    )

    out_padded = pl.pallas_call(
        _make_kernel(ts),
        out_shape=jax.ShapeDtypeStruct((B, ap), jnp.float32),
        grid=(n_bt, S // ts),
        in_specs=in_specs,
        out_specs=pl.BlockSpec((tb, ap), lambda i, s: (i, 0)),
        scratch_shapes=[pltpu.VMEM((tb * C, LANE), jnp.float32)],
        compiler_params=pltpu.CompilerParams(
            # batch tiles are independent (megacore-shardable on v7x); the
            # spatial axis is the pooling reduction and stays sequential/last.
            dimension_semantics=("parallel", "arbitrary"),
            vmem_limit_bytes=vmem_limit,
        ),
        cost_estimate=cost,
    )(imgf, state_p, sel, wimg_rep,
      kparams["w1"], kparams["b1"],
      kparams["w2_img"], kparams["w2_state"], kparams["b2"],
      kparams["w3"], kparams["b3"])
    # Lane-padded output -> real act_dim outside the kernel.
    return out_padded[:, :act_dim]


def vismlp_forward(img, state_obs, kparams, *, act_dim, tb=None, ts=None):
    """img: [B, C, H, W] (f32 or bf16); state_obs: [B, obs_dim] f32."""
    B, C, H, W = img.shape
    S = H * W
    itemsize = jnp.dtype(img.dtype).itemsize
    budget, vmem_limit = _vmem_plan()
    if tb is None:
        tb = _choose_batch_tile(B, C, S, itemsize, budget)
    if ts is None:
        ts = _choose_spatial_tile(S, tb * C, itemsize, budget)
    return _vismlp_forward(img, state_obs, kparams, act_dim=act_dim,
                           tb=tb, ts=ts, vmem_limit=vmem_limit)


def init_params(key, img_channels, obs_dim, act_dim, hidden_size):
    """Deterministic synthetic init (xavier-uniform, gain=sqrt(2), zero bias)."""
    ks = jax.random.split(key, 4)

    def xavier(k, fan_in, fan_out):
        gain = jnp.sqrt(2.0)  # nn.init.calculate_gain('relu')
        limit = gain * jnp.sqrt(6.0 / (fan_in + fan_out))
        return jax.random.uniform(k, (fan_in, fan_out), jnp.float32,
                                  minval=-limit, maxval=limit)

    wimg = xavier(ks[0], img_channels, CNN_DIM)              # cnn stand-in proj
    w1 = xavier(ks[1], obs_dim, hidden_size)
    b1 = jnp.zeros((1, hidden_size), jnp.float32)
    w2 = xavier(ks[2], CNN_DIM + hidden_size, hidden_size)
    b2 = jnp.zeros((1, hidden_size), jnp.float32)
    w3 = xavier(ks[3], hidden_size, act_dim)
    b3 = jnp.zeros((1, act_dim), jnp.float32)
    return {
        "wimg": wimg,
        "w1": w1, "b1": b1,
        "w2_img": w2[:CNN_DIM, :], "w2_state": w2[CNN_DIM:, :], "b2": b2,
        "w3": w3, "b3": b3,
    }


def reference_forward(img, state_obs, params):
    """Pure-JAX reference mirroring the PyTorch forward (img: [B,C,H,W] f32)."""
    B, C, H, W = img.shape
    pooled = jnp.mean(img.reshape(B, C, H * W), axis=-1)         # avgpool
    img_embed = pooled @ params["wimg"]
    state_embed = jax.nn.relu(state_obs @ params["w1"] + params["b1"])
    embed = jnp.concatenate([img_embed, state_embed], axis=-1)
    w2 = jnp.concatenate([params["w2_img"], params["w2_state"]], axis=0)
    h = jax.nn.relu(embed @ w2 + params["b2"])
    return jnp.tanh(h @ params["w3"] + params["b3"])


if __name__ == "__main__":
    # Small demo shapes: B=32 lets the auto-chooser pick tb=16, giving two
    # independent batch tiles (megacore-shardable on v7x) and bf16-pack-aligned
    # image rows (tb*C = 48, a multiple of 16).  Spatial stays untiled (ts=S).
    B, C, H, W = 32, 3, 16, 16
    OBS_DIM, ACT_DIM, HIDDEN = 8, 4, 32

    key = jax.random.PRNGKey(0)
    k_img, k_state, k_params = jax.random.split(key, 3)

    # Image in NCHW like PyTorch, stored bf16 (DMA-dominant input).
    img = jax.random.normal(k_img, (B, C, H, W), jnp.float32).astype(jnp.bfloat16)
    state_obs = jax.random.normal(k_state, (B, OBS_DIM), jnp.float32)

    params = init_params(k_params, C, OBS_DIM, ACT_DIM, HIDDEN)
    kparams = prepare_kernel_params(params)

    out = vismlp_forward(img, state_obs, kparams, act_dim=ACT_DIM)
    out = jax.block_until_ready(out)

    with jax.default_matmul_precision("highest"):
        ref = reference_forward(img.astype(jnp.float32), state_obs, params)

    assert out.shape == (B, ACT_DIM)
    assert jnp.allclose(out, ref, atol=1e-3, rtol=1e-3), (out, ref)

    print("KERNEL_OK")
</pallas_src>

<mosaic_0001>
module attributes {stable_mosaic.version = 11 : i64} {
  func.func @kernel(%arg0: i32, %arg1: i32, %arg2: memref<48x256xbf16, #tpu.memory_space<vmem>>, %arg3: memref<16x128xf32, #tpu.memory_space<vmem>>, %arg4: memref<16x48xf32, #tpu.memory_space<vmem>>, %arg5: memref<48x512xf32, #tpu.memory_space<vmem>>, %arg6: memref<128x128xf32, #tpu.memory_space<vmem>>, %arg7: memref<1x128xf32, #tpu.memory_space<vmem>>, %arg8: memref<512x128xf32, #tpu.memory_space<vmem>>, %arg9: memref<128x128xf32, #tpu.memory_space<vmem>>, %arg10: memref<1x128xf32, #tpu.memory_space<vmem>>, %arg11: memref<128x128xf32, #tpu.memory_space<vmem>>, %arg12: memref<1x128xf32, #tpu.memory_space<vmem>>, %arg13: memref<16x128xf32, #tpu.memory_space<vmem>>, %arg14: memref<48x128xf32, #tpu.memory_space<vmem>>) attributes {dimension_semantics = [#tpu.dimension_semantics<parallel>, #tpu.dimension_semantics<arbitrary>], iteration_bounds = array<i64: 2, 1>, scalar_prefetch = 0 : i64, scratch_operands = 1 : i64, tpu.core_type = #tpu.core_type<tc>, window_params = [{transform_indices = @transform_0, window_bounds = array<i64: 48, 256>}, {transform_indices = @transform_1, window_bounds = array<i64: 16, 128>}, {pipeline_mode = #tpu.pipeline_mode<synchronous>, transform_indices = @transform_2, window_bounds = array<i64: 16, 48>}, {pipeline_mode = #tpu.pipeline_mode<synchronous>, transform_indices = @transform_3, window_bounds = array<i64: 48, 512>}, {pipeline_mode = #tpu.pipeline_mode<synchronous>, transform_indices = @transform_4, window_bounds = array<i64: 128, 128>}, {pipeline_mode = #tpu.pipeline_mode<synchronous>, transform_indices = @transform_5, window_bounds = array<i64: 1, 128>}, {pipeline_mode = #tpu.pipeline_mode<synchronous>, transform_indices = @transform_6, window_bounds = array<i64: 512, 128>}, {pipeline_mode = #tpu.pipeline_mode<synchronous>, transform_indices = @transform_7, window_bounds = array<i64: 128, 128>}, {pipeline_mode = #tpu.pipeline_mode<synchronous>, transform_indices = @transform_8, window_bounds = array<i64: 1, 128>}, {pipeline_mode = #tpu.pipeline_mode<synchronous>, transform_indices = @transform_9, window_bounds = array<i64: 128, 128>}, {pipeline_mode = #tpu.pipeline_mode<synchronous>, transform_indices = @transform_10, window_bounds = array<i64: 1, 128>}, {transform_indices = @transform_11, window_bounds = array<i64: 16, 128>}]} {
    %c0_i32 = arith.constant 0 : i32
    %0 = arith.cmpi eq, %arg1, %c0_i32 : i32
    %1 = arith.extui %0 : i1 to i32
    %c0_i32_0 = arith.constant 0 : i32
    %2 = arith.cmpi ne, %1, %c0_i32_0 : i32
    scf.if %2 {
      %cst = arith.constant 0.000000e+00 : f32
      %15 = vector.broadcast %cst : f32 to vector<48x128xf32>
      %c0_8 = arith.constant 0 : index
      %c0_9 = arith.constant 0 : index
      %16 = vector.load %arg14[%c0_8, %c0_9] : memref<48x128xf32, #tpu.memory_space<vmem>>, vector<48x128xf32>
      tpu.vector_store %arg14[%c0_8, %c0_9], %15 {strides = array<i32>} : memref<48x128xf32, #tpu.memory_space<vmem>>, vector<48x128xf32>,
    } else {
    }
    %c0 = arith.constant 0 : index
    %c0_1 = arith.constant 0 : index
    %3 = vector.load %arg2[%c0, %c0_1] : memref<48x256xbf16, #tpu.memory_space<vmem>>, vector<48x256xbf16>
    %4 = vector.extract_strided_slice %3 {offsets = [0, 0], sizes = [48, 128], strides = [1, 1]} : vector<48x256xbf16> to vector<48x128xbf16>
    %5 = arith.extf %4 : vector<48x128xbf16> to vector<48x128xf32>
    %6 = vector.extract_strided_slice %3 {offsets = [0, 128], sizes = [48, 128], strides = [1, 1]} : vector<48x256xbf16> to vector<48x128xbf16>
    %7 = arith.extf %6 : vector<48x128xbf16> to vector<48x128xf32>
    %8 = arith.addf %5, %7 : vector<48x128xf32>
    %c0_2 = arith.constant 0 : index
    %c0_3 = arith.constant 0 : index
    %9 = vector.load %arg14[%c0_2, %c0_3] : memref<48x128xf32, #tpu.memory_space<vmem>>, vector<48x128xf32>
    %10 = arith.addf %9, %8 : vector<48x128xf32>
    %c0_4 = arith.constant 0 : index
    %c0_5 = arith.constant 0 : index
    %11 = vector.load %arg14[%c0_4, %c0_5] : memref<48x128xf32, #tpu.memory_space<vmem>>, vector<48x128xf32>
    tpu.vector_store %arg14[%c0_4, %c0_5], %10 {strides = array<i32>} : memref<48x128xf32, #tpu.memory_space<vmem>>, vector<48x128xf32>,
    %c0_i32_6 = arith.constant 0 : i32
    %12 = arith.cmpi eq, %arg1, %c0_i32_6 : i32
    %13 = arith.extui %12 : i1 to i32
    %c0_i32_7 = arith.constant 0 : i32
    %14 = arith.cmpi ne, %13, %c0_i32_7 : i32
    scf.if %14 {
      %c0_8 = arith.constant 0 : index
      %c0_9 = arith.constant 0 : index
      %15 = vector.load %arg14[%c0_8, %c0_9] : memref<48x128xf32, #tpu.memory_space<vmem>>, vector<48x128xf32>
      %cst = arith.constant dense<0.000000e+00> : vector<48xf32>
      %16 = vector.multi_reduction <add>, %15, %cst [1] : vector<48x128xf32> to vector<48xf32>
      %17 = vector.shape_cast %16 : vector<48xf32> to vector<48x1xf32>
      %c0_10 = arith.constant 0 : index
      %c0_11 = arith.constant 0 : index
      %18 = vector.load %arg5[%c0_10, %c0_11] : memref<48x512xf32, #tpu.memory_space<vmem>>, vector<48x512xf32>
      %19 = vector.broadcast %17 : vector<48x1xf32> to vector<48x512xf32>
      %20 = arith.mulf %19, %18 : vector<48x512xf32>
      %c0_12 = arith.constant 0 : index
      %c0_13 = arith.constant 0 : index
      %21 = vector.load %arg4[%c0_12, %c0_13] : memref<16x48xf32, #tpu.memory_space<vmem>>, vector<16x48xf32>
      %cst_14 = arith.constant dense<0.000000e+00> : vector<16x512xf32>
      %22 = tpu.matmul %21, %20, %cst_14 {dimension_numbers = #tpu.dot_dimension_numbers<[1], [0], [0], [1], [0, 0, 1, 1], [], []>} : vector<16x48xf32>, vector<48x512xf32>, vector<16x512xf32> -> vector<16x512xf32>
      %c0_15 = arith.constant 0 : index
      %c0_16 = arith.constant 0 : index
      %23 = vector.load %arg3[%c0_15, %c0_16] : memref<16x128xf32, #tpu.memory_space<vmem>>, vector<16x128xf32>
      %c0_17 = arith.constant 0 : index
      %c0_18 = arith.constant 0 : index
      %24 = vector.load %arg6[%c0_17, %c0_18] : memref<128x128xf32, #tpu.memory_space<vmem>>, vector<128x128xf32>
      %cst_19 = arith.constant dense<0.000000e+00> : vector<16x128xf32>
      %25 = tpu.matmul %23, %24, %cst_19 {dimension_numbers = #tpu.dot_dimension_numbers<[1], [0], [0], [1], [0, 0, 1, 1], [], []>} : vector<16x128xf32>, vector<128x128xf32>, vector<16x128xf32> -> vector<16x128xf32>
      %c0_20 = arith.constant 0 : index
      %c0_21 = arith.constant 0 : index
      %26 = vector.load %arg7[%c0_20, %c0_21] : memref<1x128xf32, #tpu.memory_space<vmem>>, vector<1x128xf32>
      %27 = vector.broadcast %26 : vector<1x128xf32> to vector<16x128xf32>
      %28 = arith.addf %25, %27 : vector<16x128xf32>
      %cst_22 = arith.constant 0.000000e+00 : f32
      %29 = vector.broadcast %cst_22 : f32 to vector<16x128xf32>
      %30 = arith.maximumf %28, %29 : vector<16x128xf32>
      %c0_23 = arith.constant 0 : index
      %c0_24 = arith.constant 0 : index
      %31 = vector.load %arg8[%c0_23, %c0_24] : memref<512x128xf32, #tpu.memory_space<vmem>>, vector<512x128xf32>
      %cst_25 = arith.constant dense<0.000000e+00> : vector<16x128xf32>
      %32 = tpu.matmul %22, %31, %cst_25 {dimension_numbers = #tpu.dot_dimension_numbers<[1], [0], [0], [1], [0, 0, 1, 1], [], []>} : vector<16x512xf32>, vector<512x128xf32>, vector<16x128xf32> -> vector<16x128xf32>
      %c0_26 = arith.constant 0 : index
      %c0_27 = arith.constant 0 : index
      %33 = vector.load %arg9[%c0_26, %c0_27] : memref<128x128xf32, #tpu.memory_space<vmem>>, vector<128x128xf32>
      %cst_28 = arith.constant dense<0.000000e+00> : vector<16x128xf32>
      %34 = tpu.matmul %30, %33, %cst_28 {dimension_numbers = #tpu.dot_dimension_numbers<[1], [0], [0], [1], [0, 0, 1, 1], [], []>} : vector<16x128xf32>, vector<128x128xf32>, vector<16x128xf32> -> vector<16x128xf32>
      %35 = arith.addf %32, %34 : vector<16x128xf32>
      %c0_29 = arith.constant 0 : index
      %c0_30 = arith.constant 0 : index
      %36 = vector.load %arg10[%c0_29, %c0_30] : memref<1x128xf32, #tpu.memory_space<vmem>>, vector<1x128xf32>
      %37 = vector.broadcast %36 : vector<1x128xf32> to vector<16x128xf32>
      %38 = arith.addf %35, %37 : vector<16x128xf32>
      %cst_31 = arith.constant 0.000000e+00 : f32
      %39 = vector.broadcast %cst_31 : f32 to vector<16x128xf32>
      %40 = arith.maximumf %38, %39 : vector<16x128xf32>
      %c0_32 = arith.constant 0 : index
      %c0_33 = arith.constant 0 : index
      %41 = vector.load %arg11[%c0_32, %c0_33] : memref<128x128xf32, #tpu.memory_space<vmem>>, vector<128x128xf32>
      %cst_34 = arith.constant dense<0.000000e+00> : vector<16x128xf32>
      %42 = tpu.matmul %40, %41, %cst_34 {dimension_numbers = #tpu.dot_dimension_numbers<[1], [0], [0], [1], [0, 0, 1, 1], [], []>} : vector<16x128xf32>, vector<128x128xf32>, vector<16x128xf32> -> vector<16x128xf32>
      %c0_35 = arith.constant 0 : index
      %c0_36 = arith.constant 0 : index
      %43 = vector.load %arg12[%c0_35, %c0_36] : memref<1x128xf32, #tpu.memory_space<vmem>>, vector<1x128xf32>
      %44 = vector.broadcast %43 : vector<1x128xf32> to vector<16x128xf32>
      %45 = arith.addf %42, %44 : vector<16x128xf32>
      %46 = math.tanh %45 : vector<16x128xf32>
      %c0_37 = arith.constant 0 : index
      %c0_38 = arith.constant 0 : index
      %47 = vector.load %arg13[%c0_37, %c0_38] : memref<16x128xf32, #tpu.memory_space<vmem>>, vector<16x128xf32>
      tpu.vector_store %arg13[%c0_37, %c0_38], %46 {strides = array<i32>} : memref<16x128xf32, #tpu.memory_space<vmem>>, vector<16x128xf32>,
    } else {
    }
    return
  }
  func.func @transform_0(%arg0: i32, %arg1: i32) -> (i32, i32) {
    %c0_i32 = arith.constant 0 : i32
    return %arg0, %arg1 : i32, i32
  }
  func.func @transform_1(%arg0: i32, %arg1: i32) -> (i32, i32) {
    %c0_i32 = arith.constant 0 : i32
    %c0_i32_0 = arith.constant 0 : i32
    return %arg0, %c0_i32 : i32, i32
  }
  func.func @transform_2(%arg0: i32, %arg1: i32) -> (i32, i32) {
    %c0_i32 = arith.constant 0 : i32
    %c0_i32_0 = arith.constant 0 : i32
    %c0_i32_1 = arith.constant 0 : i32
    return %c0_i32, %c0_i32_0 : i32, i32
  }
  func.func @transform_3(%arg0: i32, %arg1: i32) -> (i32, i32) {
    %c0_i32 = arith.constant 0 : i32
    %c0_i32_0 = arith.constant 0 : i32
    %c0_i32_1 = arith.constant 0 : i32
    return %c0_i32, %c0_i32_0 : i32, i32
  }
  func.func @transform_4(%arg0: i32, %arg1: i32) -> (i32, i32) {
    %c0_i32 = arith.constant 0 : i32
    %c0_i32_0 = arith.constant 0 : i32
    %c0_i32_1 = arith.constant 0 : i32
    return %c0_i32, %c0_i32_0 : i32, i32
  }
  func.func @transform_5(%arg0: i32, %arg1: i32) -> (i32, i32) {
    %c0_i32 = arith.constant 0 : i32
    %c0_i32_0 = arith.constant 0 : i32
    %c0_i32_1 = arith.constant 0 : i32
    return %c0_i32, %c0_i32_0 : i32, i32
  }
  func.func @transform_6(%arg0: i32, %arg1: i32) -> (i32, i32) {
    %c0_i32 = arith.constant 0 : i32
    %c0_i32_0 = arith.constant 0 : i32
    %c0_i32_1 = arith.constant 0 : i32
    return %c0_i32, %c0_i32_0 : i32, i32
  }
  func.func @transform_7(%arg0: i32, %arg1: i32) -> (i32, i32) {
    %c0_i32 = arith.constant 0 : i32
    %c0_i32_0 = arith.constant 0 : i32
    %c0_i32_1 = arith.constant 0 : i32
    return %c0_i32, %c0_i32_0 : i32, i32
  }
  func.func @transform_8(%arg0: i32, %arg1: i32) -> (i32, i32) {
    %c0_i32 = arith.constant 0 : i32
    %c0_i32_0 = arith.constant 0 : i32
    %c0_i32_1 = arith.constant 0 : i32
    return %c0_i32, %c0_i32_0 : i32, i32
  }
  func.func @transform_9(%arg0: i32, %arg1: i32) -> (i32, i32) {
    %c0_i32 = arith.constant 0 : i32
    %c0_i32_0 = arith.constant 0 : i32
    %c0_i32_1 = arith.constant 0 : i32
    return %c0_i32, %c0_i32_0 : i32, i32
  }
  func.func @transform_10(%arg0: i32, %arg1: i32) -> (i32, i32) {
    %c0_i32 = arith.constant 0 : i32
    %c0_i32_0 = arith.constant 0 : i32
    %c0_i32_1 = arith.constant 0 : i32
    return %c0_i32, %c0_i32_0 : i32, i32
  }
  func.func @transform_11(%arg0: i32, %arg1: i32) -> (i32, i32) {
    %c0_i32 = arith.constant 0 : i32
    %c0_i32_0 = arith.constant 0 : i32
    return %arg0, %c0_i32 : i32, i32
  }
}

</mosaic_0001>

<bundles_post_ra>
// kernel: _vismlp_forward.1
= control target key start
LH: loop header
LB: loop body
LE: loop exit
PB: predicated region body
PF: predicated region fallthrough
CT: control target
= control target key end

     0   :  { %s1718_s17 = smov 0   ;;  %s1720_s18 = smov 0   ;;  %s2196_s0 = inlined_call_operand.vmem [shape: bf16[96,256], index: 0, kind: input, shape index: {}]   ;;  %s2197_s1 = inlined_call_operand.vmem [shape: f32[32,128], index: 1, kind: input, shape index: {}]   ;;  %s2198_s2 = inlined_call_operand.vmem [shape: f32[16,48], index: 2, kind: input, shape index: {}]   ;;  %s2199_s3 = inlined_call_operand.vmem [shape: f32[48,512], index: 3, kind: input, shape index: {}]   ;;  %s2200_s4 = inlined_call_operand.vmem [shape: f32[128,128], index: 4, kind: input, shape index: {}]   ;;  %s2201_s5 = inlined_call_operand.vmem [shape: f32[1,128], index: 5, kind: input, shape index: {}]   ;;  %s2202_s6 = inlined_call_operand.vmem [shape: f32[512,128], index: 6, kind: input, shape index: {}]   ;;  %s2203_s7 = inlined_call_operand.vmem [shape: f32[128,128], index: 7, kind: input, shape index: {}]   ;;  %s2204_s8 = inlined_call_operand.vmem [shape: f32[1,128], index: 8, kind: input, shape index: {}]   ;;  %s2205_s9 = inlined_call_operand.vmem [shape: f32[128,128], index: 9, kind: input, shape index: {}]   ;;  %s2206_s10 = inlined_call_operand.vmem [shape: f32[1,128], index: 10, kind: input, shape index: {}]   ;;  %s2207_s11 = inlined_call_operand.vmem [shape: f32[32,128], index: 11, kind: output, shape index: {}]  }
   0x1   :  { %s1722_s19 = smov 0  }
   0x2 LB: > { %s33_s20 = sadd.s32 1, %s1651_s18  ;;  %p1352_p0 = scmp.ge.s32.totalorder %s1655_s19, 1  ;;  %s1655_s19 = sphi %s1722_s19, %s21_s19   ;;  %s1651_s18 = sphi %s1720_s18, %s2209_s18   ;;  %s1647_s17 = sphi %s1718_s17, %s2208_s17  }
   0x3   : > { %p35_p1 = scmp.ge.s32.totalorder %s33_s20, 2  ;;  %p369_p2 = scmp.lt.s32.totalorder %s1655_s19, 3 }
   0x5   : > { %s2211_s20 = smov (%p35_p1, %s33_s20), 0  ;;  %p370_p3 = pnand %p1352_p0, %p369_p2 }
   0x6   : > { %s419_s21 = smul.u32 (!%p370_p3), 6, %s1647_s17  ;;  %s1355_s26 = sshll.u32 (!%p370_p3), %s1647_s17, 1 }
   0x7   : > { %373 = sbr.rel (%p370_p3) target bundleno = 804 (0x324), region = 64  ;;  %p432_p4 = scmp.lt.s32.totalorder (!%p370_p3), %s1355_s26, 3 }
   0x8   : > { %p421_p5 = scmp.lt.s32.totalorder (!%p370_p3), %s419_s21, 11 }
   0xc   : > { %v762_v0 = vld [vmem:[%s2200_s4 + $0x78] sm:$0xff]  ;;  %v761_v1 = vld [vmem:[%s2200_s4 + $0x70] sm:$0xff]  ;;  %v760_v2 = vld [vmem:[%s2200_s4 + $0x68] sm:$0xff]  ;;  %s2213_s26 = smov (!%p432_p4, %s1355_s26), 3  ;;  %s2215_s21 = smov (!%p421_p5, %s419_s21), 11  ;;  %v1657_v48 = vmov 0.0  }
   0xd   : > { %1499 = vmatprep.subr.mxu0 %v762_v0  ;;  %v759_v3 = vld [vmem:[%s2200_s4 + $0x60] sm:$0xff]  ;;  %s1356_s12 = sshll.u32 %s2213_s26, 3  ;;  %s1368_s13 = sshll.u32 %s2215_s21, 3  ;;  %v758_v4 = vld [vmem:[%s2200_s4 + $0x58] sm:$0xff]  ;;  %v757_v5 = vld [vmem:[%s2200_s4 + $0x50] sm:$0xff]  ;;  %655 = vmatprep.mubr.f32.mxu1 %v1657_v48  ;;  %vm584_vm0 = vcmask 392192  }
   0xe   : > { %1500 = vmatpush3.msra.mxu0 %v762_v0  ;;  %s1759_s22 = scalar_lea.vmem %s2197_s1, %s1356_s12  ;;  %s428_s25 = scalar_lea.vmem %s2196_s0, %s1368_s13  ;;  %v756_v19 = vld [vmem:[%s2200_s4 + $0x48] sm:$0xff]  ;;  %v755_v28 = vld [vmem:[%s2200_s4 + $0x40] sm:$0xff]  ;;  %v754_v31 = vld [vmem:[%s2200_s4 + $0x38] sm:$0xff] }
   0xf   : > { %1501 = vmatprep.subr.mxu0 %v761_v1  ;;  %v745_v6 = vld [vmem:[%s1759_s22] sm:$0xff]  ;;  %v458_v7 = vld [vmem:[%s428_s25 + $0x28] sm:$0xff]  ;;  %v456_v9 = vld [vmem:[%s428_s25 + $0x18] sm:$0xff]  ;;  %s441_s17 = scalar_lea.vmem %s2207_s11, %s1356_s12 }
  0x10   : > { %1502 = vmatpush3.msra.mxu0 %v761_v1  ;;  %v457_v8 = vld [vmem:[%s428_s25 + $0x20] sm:$0xff]  ;;  %1531 = vmatprep.mubr.f32.mxu0 %v745_v6  ;;  %v464_v10 = vunpack.c.l.bf16 %v458_v7  ;;  %v476_v11 = vrot.slane %v458_v7, 4  ;;  %v455_v13 = vld [vmem:[%s428_s25 + $0x10] sm:$0xff]  ;;  %v454_v14 = vld [vmem:[%s428_s25 + $0x8] sm:$0xff]  ;;  %v462_v16 = vunpack.c.l.bf16 %v456_v9  ;;  %v474_v17 = vrot.slane %v456_v9, 4 }
  0x11   : > { %1503 = vmatprep.subr.mxu0 %v760_v2  ;;  %v475_v12 = vrot.slane %v457_v8, 4  ;;  %v453_v15 = vld [vmem:[%s428_s25] sm:$0xff]  ;;  %v473_v18 = vrot.slane %v455_v13, 4  ;;  %v463_v21 = vunpack.c.l.bf16 %v457_v8  ;;  %v472_v23 = vrot.slane %v454_v14, 4  ;;  %v753_v38 = vld [vmem:[%s2200_s4 + $0x30] sm:$0xff]  ;;  %v752_v39 = vld [vmem:[%s2200_s4 + $0x28] sm:$0xff] }
  0x12   : > { %1504 = vmatpush3.msra.mxu0 %v760_v2  ;;  %v488_v20 = vunpack.c.l.bf16 %v476_v11  ;;  %v486_v24 = vunpack.c.l.bf16 %v474_v17  ;;  %v461_v25 = vunpack.c.l.bf16 %v455_v13  ;;  %v471_v27 = vrot.slane %v453_v15, 4  ;;  %v751_v42 = vld [vmem:[%s2200_s4 + $0x20] sm:$0xff]  ;;  %v750_v43 = vld [vmem:[%s2200_s4 + $0x18] sm:$0xff]  ;;  %v749_v44 = vld [vmem:[%s2200_s4 + $0x10] sm:$0xff] }
  0x13   : > { %1505 = vmatprep.subr.mxu0 %v759_v3  ;;  %v487_v22 = vunpack.c.l.bf16 %v475_v12  ;;  %v485_v26 = vunpack.c.l.bf16 %v473_v18  ;;  %v460_v33 = vunpack.c.l.bf16 %v454_v14  ;;  %v484_v34 = vunpack.c.l.bf16 %v472_v23  ;;  %v748_v45 = vld [vmem:[%s2200_s4 + $0x8] sm:$0xff]  ;;  %v747_v46 = vld [vmem:[%s2200_s4] sm:$0xff]  ;;  %v878_v49 = vld [vmem:[%s2202_s6 + $0xf8] sm:$0xff] }
  0x14   : > { %1506 = vmatpush3.msra.mxu0 %v759_v3  ;;  %v494_v29 = vadd.f32 %v488_v20, %v464_v10  ;;  %v492_v30 = vadd.f32 %v486_v24, %v462_v16  ;;  %v459_v36 = vunpack.c.l.bf16 %v453_v15  ;;  %v483_v37 = vunpack.c.l.bf16 %v471_v27  ;;  %v746_v47 = vld [vmem:[%s1759_s22 + $0x8] sm:$0xff]  ;;  %v862_v50 = vld [vmem:[%s2202_s6 + $0x78] sm:$0xff]  ;;  %v877_v51 = vld [vmem:[%s2202_s6 + $0xf0] sm:$0xff] }
  0x15   : > { %1507 = vmatprep.subr.mxu0 %v758_v4  ;;  %v493_v32 = vadd.f32 %v487_v22, %v463_v21  ;;  %v491_v35 = vadd.f32 %v485_v26, %v461_v25  ;;  %v490_v40 = vadd.f32 %v484_v34, %v460_v33  ;;  %v861_v52 = vld [vmem:[%s2202_s6 + $0x70] sm:$0xff]  ;;  %v876_v53 = vld [vmem:[%s2202_s6 + $0xe8] sm:$0xff]  ;;  %v875_v55 = vld [vmem:[%s2202_s6 + $0xe0] sm:$0xff] }
  0x16   : > { %1508 = vmatpush3.msra.mxu0 %v758_v4  ;;  %532 = vadd.xlane.f32.xlu0 %v494_v29  ;;  %v489_v41 = vadd.f32 %v483_v37, %v459_v36  ;;  %v860_v54 = vld [vmem:[%s2202_s6 + $0x68] sm:$0xff]  ;;  %v859_v56 = vld [vmem:[%s2202_s6 + $0x60] sm:$0xff]  ;;  %v874_v57 = vld [vmem:[%s2202_s6 + $0xd8] sm:$0xff] }
  0x17   : > { %1509 = vmatprep.subr.mxu0 %v757_v5  ;;  %528 = vadd.xlane.f32.xlu1 %v492_v30  ;;  %v858_v58 = vld [vmem:[%s2202_s6 + $0x58] sm:$0xff]  ;;  %v873_v59 = vld [vmem:[%s2202_s6 + $0xd0] sm:$0xff]  ;;  %v872_v61 = vld [vmem:[%s2202_s6 + $0xc8] sm:$0xff] }
  0x18   : > { %1510 = vmatpush3.msra.mxu0 %v757_v5  ;;  %v857_v60 = vld [vmem:[%s2202_s6 + $0x50] sm:$0xff]  ;;  %v856_v62 = vld [vmem:[%s2202_s6 + $0x48] sm:$0xff]  ;;  %v871_v63 = vld [vmem:[%s2202_s6 + $0xc0] sm:$0xff] }
  0x19   : > { %1511 = vmatprep.subr.mxu0 %v756_v19  ;;  %v855_v0 = vld [vmem:[%s2202_s6 + $0x40] sm:$0xff]  ;;  %v870_v1 = vld [vmem:[%s2202_s6 + $0xb8] sm:$0xff]  ;;  %v869_v3 = vld [vmem:[%s2202_s6 + $0xb0] sm:$0xff] }
  0x1a   : > { %1512 = vmatpush3.msra.mxu0 %v756_v19  ;;  %530 = vadd.xlane.f32.xlu0 %v493_v32  ;;  %v854_v2 = vld [vmem:[%s2202_s6 + $0x38] sm:$0xff]  ;;  %v853_v4 = vld [vmem:[%s2202_s6 + $0x30] sm:$0xff]  ;;  %v868_v5 = vld [vmem:[%s2202_s6 + $0xa8] sm:$0xff] }
  0x1b   : > { %1513 = vmatprep.subr.mxu0 %v755_v28  ;;  %526 = vadd.xlane.f32.xlu1 %v491_v35  ;;  %v852_v6 = vld [vmem:[%s2202_s6 + $0x28] sm:$0xff]  ;;  %v867_v7 = vld [vmem:[%s2202_s6 + $0xa0] sm:$0xff]  ;;  %v866_v9 = vld [vmem:[%s2202_s6 + $0x98] sm:$0xff] }
  0x1c   : > { %1514 = vmatpush3.msra.mxu0 %v755_v28  ;;  %v851_v8 = vld [vmem:[%s2202_s6 + $0x20] sm:$0xff]  ;;  %v850_v10 = vld [vmem:[%s2202_s6 + $0x18] sm:$0xff]  ;;  %v865_v11 = vld [vmem:[%s2202_s6 + $0x90] sm:$0xff] }
  0x1d   : > { %1515 = vmatprep.subr.mxu0 %v754_v31  ;;  %v849_v12 = vld [vmem:[%s2202_s6 + $0x10] sm:$0xff]  ;;  %v555_v13 = vld [vmem:[%s2199_s3 + $0xa8] sm:$0xff]  ;;  %v554_v14 = vld [vmem:[%s2199_s3 + $0xa0] sm:$0xff] }
  0x1e   : > { %1516 = vmatpush3.msra.mxu0 %v754_v31  ;;  %524 = vadd.xlane.f32.xlu0 %v490_v40  ;;  %v551_v19 = vld [vmem:[%s2199_s3 + $0x88] sm:$0xff]  ;;  %v550_v20 = vld [vmem:[%s2199_s3 + $0x80] sm:$0xff] }
  0x1f   : > { %1517 = vmatprep.subr.mxu0 %v753_v38  ;;  %522 = vadd.xlane.f32.xlu1 %v489_v41  ;;  %v547_v22 = vld [vmem:[%s2199_s3 + $0x68] sm:$0xff]  ;;  %v546_v27 = vld [vmem:[%s2199_s3 + $0x60] sm:$0xff] }
  0x20   : > { %1518 = vmatpush3.msra.mxu0 %v753_v38  ;;  %v543_v23 = vld [vmem:[%s2199_s3 + $0x48] sm:$0xff]  ;;  %v542_v28 = vld [vmem:[%s2199_s3 + $0x40] sm:$0xff] }
  0x21   : > { %1519 = vmatprep.subr.mxu0 %v752_v39  ;;  %v539_v29 = vld [vmem:[%s2199_s3 + $0x28] sm:$0xff]  ;;  %v538_v31 = vld [vmem:[%s2199_s3 + $0x20] sm:$0xff] }
  0x22   : > { %1520 = vmatpush3.msra.mxu0 %v752_v39  ;;  %v535_v36 = vld [vmem:[%s2199_s3 + $0x8] sm:$0xff]  ;;  %v534_v38 = vld [vmem:[%s2199_s3] sm:$0xff] }
  0x23   : > { %1521 = vmatprep.subr.mxu0 %v751_v42 }
  0x24   : > { %1522 = vmatpush3.msra.mxu0 %v751_v42 }
  0x25   : > { %1523 = vmatprep.subr.mxu0 %v750_v43 }
  0x26   : > { %1524 = vmatpush3.msra.mxu0 %v750_v43  ;;  %v557_v43 = vld [vmem:[%s2199_s3 + $0xb8] sm:$0xff] }
  0x27   : > { %1525 = vmatprep.subr.mxu0 %v749_v44 }
  0x28   : > { %1526 = vmatpush3.msra.mxu0 %v749_v44  ;;  %v556_v44 = vld [vmem:[%s2199_s3 + $0xb0] sm:$0xff] }
  0x29   : > { %1527 = vmatprep.subr.mxu0 %v748_v45 }
  0x2a   : > { %1528 = vmatpush3.msra.mxu0 %v748_v45  ;;  %v582_v45 = vld [vmem:[%s2198_s2] sm:$0xff] }
  0x2b   : > { %1529 = vmatprep.subr.mxu0 %v747_v46 }
  0x2c   : > { %1530 = vmatpush3.msra.mxu0 %v747_v46  ;;  %v553_v46 = vld [vmem:[%s2199_s3 + $0x98] sm:$0xff] }
  0x2d   : > { %1532 = vmatmul.mubr.f32.vlgmr.msra.gmra.mxu0 %v746_v47  ;;  %1405 = vmatprep.subr.mxu0 %v878_v49  ;;  %v552_v47 = vld [vmem:[%s2199_s3 + $0x90] sm:$0xff] }
  0x2e   : > { %1406 = vmatpush3.msra.mxu0 %v862_v50 }
  0x2f   : > { %1407 = vmatprep.subr.mxu0 %v877_v51  ;;  %v549_v51 = vld [vmem:[%s2199_s3 + $0x78] sm:$0xff] }
  0x30   : > { %1408 = vmatpush3.msra.mxu0 %v861_v52  ;;  %v548_v52 = vld [vmem:[%s2199_s3 + $0x70] sm:$0xff] }
  0x31   : > { %1409 = vmatprep.subr.mxu0 %v876_v53 }
  0x32   : > { %1410 = vmatpush3.msra.mxu0 %v860_v54 }
  0x33   : > { %1411 = vmatprep.subr.mxu0 %v875_v55  ;;  %v583_v55 = vld [vmem:[%s2198_s2 + $0x8] sm:$0xff] }
  0x34   : > { %1412 = vmatpush3.msra.mxu0 %v859_v56  ;;  %v545_v56 = vld [vmem:[%s2199_s3 + $0x58] sm:$0xff] }
  0x35   : > { %1413 = vmatprep.subr.mxu0 %v874_v57  ;;  %v544_v57 = vld [vmem:[%s2199_s3 + $0x50] sm:$0xff] }
  0x36   : > { %1414 = vmatpush3.msra.mxu0 %v858_v58 }
  0x37   : > { %1415 = vmatprep.subr.mxu0 %v873_v59 }
  0x38   : > { %1416 = vmatpush3.msra.mxu0 %v857_v60  ;;  %v541_v60 = vld [vmem:[%s2199_s3 + $0x38] sm:$0xff] }
  0x39   : > { %1417 = vmatprep.subr.mxu0 %v872_v61  ;;  %v540_v61 = vld [vmem:[%s2199_s3 + $0x30] sm:$0xff] }
  0x3a   : > { %1418 = vmatpush3.msra.mxu0 %v856_v62 }
  0x3b   : > { %1419 = vmatprep.subr.mxu0 %v871_v63 }
  0x3c   : > { %1420 = vmatpush3.msra.mxu0 %v855_v0  ;;  %v537_v0 = vld [vmem:[%s2199_s3 + $0x18] sm:$0xff] }
  0x3d   : > { %1421 = vmatprep.subr.mxu0 %v870_v1 }
  0x3e   : > { %1422 = vmatpush3.msra.mxu0 %v854_v2  ;;  %v536_v2 = vld [vmem:[%s2199_s3 + $0x10] sm:$0xff] }
  0x3f   : > { %1423 = vmatprep.subr.mxu0 %v869_v3 }
  0x40   : > { %1424 = vmatpush3.msra.mxu0 %v853_v4 }
  0x41   : > { %1425 = vmatprep.subr.mxu0 %v868_v5 }
  0x42   : > { %1426 = vmatpush3.msra.mxu0 %v852_v6  ;;  %v926_v6 = vld [vmem:[%s2203_s7 + $0x78] sm:$0xff] }
  0x43   : > { %1427 = vmatprep.subr.mxu0 %v867_v7  ;;  %v925_v7 = vld [vmem:[%s2203_s7 + $0x70] sm:$0xff] }
  0x44   : > { %1428 = vmatpush3.msra.mxu0 %v851_v8  ;;  %v924_v8 = vld [vmem:[%s2203_s7 + $0x68] sm:$0xff] }
  0x45   : > { %1429 = vmatprep.subr.mxu0 %v866_v9  ;;  %v923_v9 = vld [vmem:[%s2203_s7 + $0x60] sm:$0xff] }
  0x46   : > { %1430 = vmatpush3.msra.mxu0 %v850_v10  ;;  %v922_v10 = vld [vmem:[%s2203_s7 + $0x58] sm:$0xff] }
  0x47   : > { %1431 = vmatprep.subr.mxu0 %v865_v11  ;;  %v920_v11 = vld [vmem:[%s2203_s7 + $0x48] sm:$0xff] }
  0x48   : > { %1432 = vmatpush3.msra.mxu0 %v849_v12  ;;  %v919_v12 = vld [vmem:[%s2203_s7 + $0x40] sm:$0xff] }
  0x9f   : > { %v533_v15 = vpop.xlane.xlu0 %532 }
  0xa0   : > { %v579_v16 = vmul.f32 %v555_v13, %v533_v15  ;;  %v578_v17 = vmul.f32 %v554_v14, %v533_v15  ;;  %v529_v18 = vpop.xlane.xlu1 %528  ;;  %v581_v49 = vmul.f32 %v557_v43, %v533_v15  ;;  %v580_v50 = vmul.f32 %v556_v44, %v533_v15  ;;  %v918_v13 = vld [vmem:[%s2203_s7 + $0x38] sm:$0xff]  ;;  %v917_v14 = vld [vmem:[%s2203_s7 + $0x30] sm:$0xff]  ;;  %v916_v15 = vld [vmem:[%s2203_s7 + $0x28] sm:$0xff] }
  0xa1   : > { %v571_v30 = vmul.f32 %v547_v22, %v529_v18  ;;  %v570_v33 = vmul.f32 %v546_v27, %v529_v18  ;;  %v573_v58 = vmul.f32 %v549_v51, %v529_v18  ;;  %v572_v59 = vmul.f32 %v548_v52, %v529_v18  ;;  %v913_v18 = vld [vmem:[%s2203_s7 + $0x10] sm:$0xff]  ;;  %v1363_v22 = vld [vmem:[%s2201_s5] ss:$0 sm:$0xff]  ;;  %v904_v44 = vld [vmem:[%s2202_s6 + $0x1c8] sm:$0xff] }
  0xa2   : > { %611 = vmatprep.subr.mxu1 %v579_v16  ;;  %v915_v16 = vld [vmem:[%s2203_s7 + $0x20] sm:$0xff]  ;;  %v889_v43 = vld [vmem:[%s2202_s6 + $0x150] sm:$0xff] }
  0xa3   : > { %612 = vmatpush1.msra.mxu1 %v578_v17  ;;  %v531_v21 = vpop.xlane.xlu0 %530  ;;  %v914_v17 = vld [vmem:[%s2203_s7 + $0x18] sm:$0xff]  ;;  %v901_v51 = vld [vmem:[%s2202_s6 + $0x1b0] sm:$0xff] }
  0xa4   : > { %v575_v24 = vmul.f32 %v551_v19, %v531_v21  ;;  %v574_v25 = vmul.f32 %v550_v20, %v531_v21  ;;  %v527_v26 = vpop.xlane.xlu1 %526  ;;  %v577_v53 = vmul.f32 %v553_v46, %v531_v21  ;;  %v576_v54 = vmul.f32 %v552_v47, %v531_v21  ;;  %v912_v19 = vld [vmem:[%s2203_s7 + $0x8] sm:$0xff]  ;;  %v911_v20 = vld [vmem:[%s2203_s7] sm:$0xff]  ;;  %v910_v21 = vld [vmem:[%s2202_s6 + $0x1f8] sm:$0xff] }
  0xa5   : > { %v567_v32 = vmul.f32 %v543_v23, %v527_v26  ;;  %v566_v35 = vmul.f32 %v542_v28, %v527_v26  ;;  %v569_v62 = vmul.f32 %v545_v56, %v527_v26  ;;  %v568_v63 = vmul.f32 %v544_v57, %v527_v26  ;;  %v903_v46 = vld [vmem:[%s2202_s6 + $0x1c0] sm:$0xff]  ;;  %v885_v52 = vld [vmem:[%s2202_s6 + $0x130] sm:$0xff]  ;;  %v898_v57 = vld [vmem:[%s2202_s6 + $0x198] sm:$0xff] }
  0xa6   : > { %613 = vmatprep.subr.mxu1 %v575_v24  ;;  %v887_v47 = vld [vmem:[%s2202_s6 + $0x140] sm:$0xff] }
  0xa7   : > { %614 = vmatpush1.msra.mxu1 %v574_v25  ;;  %v525_v34 = vpop.xlane.xlu0 %524  ;;  %v883_v56 = vld [vmem:[%s2202_s6 + $0x120] sm:$0xff] }
  0xa8   : > { %615 = vmatprep.subr.mxu1 %v571_v30  ;;  %v563_v37 = vmul.f32 %v539_v29, %v525_v34  ;;  %v523_v39 = vpop.xlane.xlu1 %522  ;;  %v562_v40 = vmul.f32 %v538_v31, %v525_v34  ;;  %v565_v1 = vmul.f32 %v541_v60, %v525_v34  ;;  %v564_v3 = vmul.f32 %v540_v61, %v525_v34  ;;  %v894_v29 = vld [vmem:[%s2202_s6 + $0x178] sm:$0xff]  ;;  %v909_v30 = vld [vmem:[%s2202_s6 + $0x1f0] sm:$0xff]  ;;  %v864_v31 = vld [vmem:[%s2202_s6 + $0x88] sm:$0xff] }
  0xa9   : > { %616 = vmatpush1.msra.mxu1 %v570_v33  ;;  %v559_v41 = vmul.f32 %v535_v36, %v523_v39  ;;  %v558_v42 = vmul.f32 %v534_v38, %v523_v39  ;;  %v561_v4 = vmul.f32 %v537_v0, %v523_v39  ;;  %v560_v5 = vmul.f32 %v536_v2, %v523_v39  ;;  %v848_v33 = vld [vmem:[%s2202_s6 + $0x8] sm:$0xff]  ;;  %v907_v38 = vld [vmem:[%s2202_s6 + $0x1e0] sm:$0xff]  ;;  %v881_v60 = vld [vmem:[%s2202_s6 + $0x110] sm:$0xff] }
  0xaa   : > { %617 = vmatprep.subr.mxu1 %v567_v32  ;;  %v893_v32 = vld [vmem:[%s2202_s6 + $0x170] sm:$0xff]  ;;  %1433 = vmatprep.subr.mxu0 %v864_v31  ;;  %v908_v34 = vld [vmem:[%s2202_s6 + $0x1e8] sm:$0xff]  ;;  %v891_v39 = vld [vmem:[%s2202_s6 + $0x160] sm:$0xff] }
  0xab   : > { %618 = vmatpush1.msra.mxu1 %v566_v35  ;;  %1434 = vmatpush3.msra.mxu0 %v848_v33  ;;  %v863_v35 = vld [vmem:[%s2202_s6 + $0x80] sm:$0xff]  ;;  %v892_v36 = vld [vmem:[%s2202_s6 + $0x168] sm:$0xff] }
  0xac   : > { %619 = vmatprep.subr.mxu1 %v563_v37  ;;  %1435 = vmatprep.subr.mxu0 %v863_v35  ;;  %v847_v37 = vld [vmem:[%s2202_s6] sm:$0xff]  ;;  %v896_v61 = vld [vmem:[%s2202_s6 + $0x188] sm:$0xff] }
  0xad   : > { %620 = vmatpush1.msra.mxu1 %v562_v40  ;;  %1436 = vmatpush3.msra.mxu0 %v847_v37  ;;  %v906_v40 = vld [vmem:[%s2202_s6 + $0x1d8] sm:$0xff]  ;;  %v879_v0 = vld [vmem:[%s2202_s6 + $0x100] sm:$0xff] }
  0xae   : > { %621 = vmatprep.subr.mxu1 %v559_v41  ;;  %v890_v41 = vld [vmem:[%s2202_s6 + $0x158] sm:$0xff]  ;;  %v1364_v37 = vld [vmem:[%s2204_s8] ss:$0 sm:$0xff] }
  0xaf   : > { %622 = vmatpush1.msra.mxu1 %v558_v42  ;;  %v905_v42 = vld [vmem:[%s2202_s6 + $0x1d0] sm:$0xff] }
  0xb0   : > { %1359 = vmatmul.mubr.msk.f32.vlgmr.msra.gmra.mxu1 %vm584_vm0, %v582_v45  ;;  %688 = vmatprep.subr.mxu1 %v581_v49  ;;  %v902_v49 = vld [vmem:[%s2202_s6 + $0x1b8] sm:$0xff] }
  0xb1   : > { %689 = vmatpush1.msra.mxu1 %v580_v50  ;;  %661 = vmatprep.mubr.f32.mxu1 %v1657_v48  ;;  %v886_v50 = vld [vmem:[%s2202_s6 + $0x138] sm:$0xff] }
  0xb2   : > { %690 = vmatprep.subr.mxu1 %v577_v53  ;;  %v900_v53 = vld [vmem:[%s2202_s6 + $0x1a8] sm:$0xff] }
  0xb3   : > { %691 = vmatpush1.msra.mxu1 %v576_v54  ;;  %v884_v54 = vld [vmem:[%s2202_s6 + $0x128] sm:$0xff] }
  0xb4   : > { %1360 = vmatmul.mubr.msk.f32.gmra.mxu1 %vm584_vm0, %v583_v55  ;;  %692 = vmatprep.subr.mxu1 %v573_v58  ;;  %v882_v58 = vld [vmem:[%s2202_s6 + $0x118] sm:$0xff] }
  0xb5   : > { %693 = vmatpush1.msra.mxu1 %v572_v59  ;;  %732 = vmatprep.mubr.f32.mxu1 %v1657_v48  ;;  %v897_v59 = vld [vmem:[%s2202_s6 + $0x190] sm:$0xff] }
  0xb6   : > { %694 = vmatprep.subr.mxu1 %v569_v62  ;;  %v880_v62 = vld [vmem:[%s2202_s6 + $0x108] sm:$0xff] }
  0xb7   : > { %695 = vmatpush1.msra.mxu1 %v568_v63  ;;  %v895_v63 = vld [vmem:[%s2202_s6 + $0x180] sm:$0xff] }
  0xb8   : > { %696 = vmatprep.subr.mxu1 %v565_v1  ;;  %v1178_v1 = vld [vmem:[%s2205_s9 + $0x78] sm:$0xff] }
  0xb9   : > { %697 = vmatpush1.msra.mxu1 %v564_v3  ;;  %1569 = vmatprep.subr.mxu0 %v1178_v1 }
  0xba   : > { %698 = vmatprep.subr.mxu1 %v561_v4  ;;  %v1177_v4 = vld [vmem:[%s2205_s9 + $0x70] sm:$0xff] }
  0xbb   : > { %699 = vmatpush1.msra.mxu1 %v560_v5 }
  0xbc   : > { %1361 = vmatmul.mubr.msk.f32.vlgmr.msra.gmra.mxu1 %vm584_vm0, %v582_v45  ;;  %1534 = vmatprep.subr.mxu1 %v926_v6  ;;  %v888_v45 = vld [vmem:[%s2202_s6 + $0x148] sm:$0xff] }
  0xbd   : > { %738 = vmatprep.mubr.f32.mxu1 %v1657_v48  ;;  %1535 = vmatpush3.msra.mxu1 %v926_v6  ;;  %v921_v48 = vld [vmem:[%s2203_s7 + $0x50] sm:$0xff]  ;;  %v1176_v6 = vld [vmem:[%s2205_s9 + $0x68] sm:$0xff] }
  0xbe   : > { %1536 = vmatprep.subr.mxu1 %v925_v7 }
  0xbf   : > { %1537 = vmatpush3.msra.mxu1 %v925_v7 }
  0xc0   : > { %1362 = vmatmul.mubr.msk.f32.gmra.mxu1 %vm584_vm0, %v583_v55  ;;  %1538 = vmatprep.subr.mxu1 %v924_v8  ;;  %v899_v55 = vld [vmem:[%s2202_s6 + $0x1a0] sm:$0xff] }
  0xc1   : > { %1539 = vmatpush3.msra.mxu1 %v924_v8 }
  0xc2   : > { %1540 = vmatprep.subr.mxu1 %v923_v9 }
  0xc3   : > { %1541 = vmatpush3.msra.mxu1 %v923_v9 }
  0xc4   : > { %1542 = vmatprep.subr.mxu1 %v922_v10 }
  0xc5   : > { %1543 = vmatpush3.msra.mxu1 %v922_v10 }
  0xc6   : > { %1544 = vmatprep.subr.mxu1 %v921_v48 }
  0xc7   : > { %1545 = vmatpush3.msra.mxu1 %v921_v48 }
  0xc8   : > { %1546 = vmatprep.subr.mxu1 %v920_v11 }
  0xc9   : > { %1547 = vmatpush3.msra.mxu1 %v920_v11  ;;  %v1175_v11 = vld [vmem:[%s2205_s9 + $0x60] sm:$0xff] }
  0xca   : > { %1548 = vmatprep.subr.mxu1 %v919_v12 }
  0xcb   : > { %1549 = vmatpush3.msra.mxu1 %v919_v12  ;;  %v1174_v12 = vld [vmem:[%s2205_s9 + $0x58] sm:$0xff] }
  0xcc   : > { %1550 = vmatprep.subr.mxu1 %v918_v13 }
  0xcd   : > { %1551 = vmatpush3.msra.mxu1 %v918_v13  ;;  %v1173_v13 = vld [vmem:[%s2205_s9 + $0x50] sm:$0xff] }
  0xce   : > { %1552 = vmatprep.subr.mxu1 %v917_v14 }
  0xcf   : > { %1553 = vmatpush3.msra.mxu1 %v917_v14  ;;  %v1172_v14 = vld [vmem:[%s2205_s9 + $0x48] sm:$0xff] }
  0xd0   : > { %1554 = vmatprep.subr.mxu1 %v916_v15 }
  0xd1   : > { %1555 = vmatpush3.msra.mxu1 %v916_v15  ;;  %v1171_v15 = vld [vmem:[%s2205_s9 + $0x40] sm:$0xff] }
  0xd2   : > { %1556 = vmatprep.subr.mxu1 %v915_v16 }
  0xd3   : > { %1557 = vmatpush3.msra.mxu1 %v915_v16  ;;  %v1170_v16 = vld [vmem:[%s2205_s9 + $0x38] sm:$0xff] }
  0xd4   : > { %1558 = vmatprep.subr.mxu1 %v914_v17 }
  0xd5   : > { %1559 = vmatpush3.msra.mxu1 %v914_v17  ;;  %v1169_v17 = vld [vmem:[%s2205_s9 + $0x30] sm:$0xff] }
  0xd6   : > { %1560 = vmatprep.subr.mxu1 %v913_v18 }
  0xd7   : > { %1561 = vmatpush3.msra.mxu1 %v913_v18  ;;  %v1168_v18 = vld [vmem:[%s2205_s9 + $0x28] sm:$0xff] }
  0xd8   : > { %1562 = vmatprep.subr.mxu1 %v912_v19 }
  0xd9   : > { %1563 = vmatpush3.msra.mxu1 %v912_v19  ;;  %v1167_v19 = vld [vmem:[%s2205_s9 + $0x20] sm:$0xff] }
  0xda   : > { %1564 = vmatprep.subr.mxu1 %v911_v20 }
  0xdb   : > { %1565 = vmatpush3.msra.mxu1 %v911_v20  ;;  %v1166_v20 = vld [vmem:[%s2205_s9 + $0x18] sm:$0xff] }
  0xdc   : > { %1443 = vmatprep.subr.mxu1 %v910_v21  ;;  %v1165_v21 = vld [vmem:[%s2205_s9 + $0x10] sm:$0xff] }
  0xed   : > { %v1533_v23 = vpop.f32.mrf.mxu0 }
  0xee   : > { %v842_v24 = vadd.f32 %v1533_v23, %v1363_v22  ;;  %v1163_v23 = vld [vmem:[%s2205_s9] sm:$0xff] }
  0xef   : > { %v836_v25 = vpop.f32.mrf.mxu0 }
  0xf0   : > { %v837_v26 = vadd.f32 %v1363_v22, %v836_v25  ;;  %v846_v27 = vmax.f32 %v842_v24, 0.0  ;;  %v1164_v22 = vld [vmem:[%s2205_s9 + $0x8] sm:$0xff] }
  0xf2   : > { %v845_v28 = vmax.f32 %v837_v26, 0.0 }
  0xf4   : > { %1566 = vmatprep.mubr.f32.mxu1 %v845_v28 }
  0xf5   : > { %1567 = vmatmul.mubr.f32.vlgmr.msra.gmra.mxu1 %v846_v27 }
  0xf6   : > { %1444 = vmatpush3.msra.mxu1 %v894_v29 }
  0xf7   : > { %1445 = vmatprep.subr.mxu1 %v909_v30 }
  0xf8   : > { %1446 = vmatpush3.msra.mxu1 %v893_v32 }
  0xf9   : > { %1447 = vmatprep.subr.mxu1 %v908_v34 }
  0xfa   : > { %1448 = vmatpush3.msra.mxu1 %v892_v36 }
  0xfb   : > { %1449 = vmatprep.subr.mxu1 %v907_v38 }
  0xfc   : > { %1450 = vmatpush3.msra.mxu1 %v891_v39 }
  0xfd   : > { %1451 = vmatprep.subr.mxu1 %v906_v40 }
  0xfe   : > { %1452 = vmatpush3.msra.mxu1 %v890_v41 }
  0xff   : > { %1453 = vmatprep.subr.mxu1 %v905_v42 }
 0x100   : > { %1454 = vmatpush3.msra.mxu1 %v889_v43 }
 0x101   : > { %1455 = vmatprep.subr.mxu1 %v904_v44 }
 0x102   : > { %1456 = vmatpush3.msra.mxu1 %v888_v45 }
 0x103   : > { %1457 = vmatprep.subr.mxu1 %v903_v46 }
 0x104   : > { %1458 = vmatpush3.msra.mxu1 %v887_v47  ;;  %v1365_v47 = vld [vmem:[%s2206_s10] ss:$0 sm:$0xff] }
 0x105   : > { %1459 = vmatprep.subr.mxu1 %v902_v49 }
 0x106   : > { %1460 = vmatpush3.msra.mxu1 %v886_v50 }
 0x107   : > { %1461 = vmatprep.subr.mxu1 %v901_v51 }
 0x108   : > { %1462 = vmatpush3.msra.mxu1 %v885_v52 }
 0x109   : > { %1463 = vmatprep.subr.mxu1 %v900_v53 }
 0x10a   : > { %1464 = vmatpush3.msra.mxu1 %v884_v54 }
 0x10b   : > { %1465 = vmatprep.subr.mxu1 %v899_v55 }
 0x10c   : > { %1466 = vmatpush3.msra.mxu1 %v883_v56 }
 0x10d   : > { %1467 = vmatprep.subr.mxu1 %v898_v57 }
 0x10e   : > { %1468 = vmatpush3.msra.mxu1 %v882_v58 }
 0x10f   : > { %1469 = vmatprep.subr.mxu1 %v897_v59 }
 0x110   : > { %1470 = vmatpush3.msra.mxu1 %v881_v60 }
 0x111   : > { %1471 = vmatprep.subr.mxu1 %v896_v61 }
 0x112   : > { %1472 = vmatpush3.msra.mxu1 %v880_v62 }
 0x113   : > { %1473 = vmatprep.subr.mxu1 %v895_v63 }
 0x114   : > { %1474 = vmatpush3.msra.mxu1 %v879_v0 }
 0x170   : > { %v657_v2 = vpop.f32.mrf.mxu1 }
 0x172   : > { %v659_v3 = vpop.f32.mrf.mxu1 }
 0x173   : > { %1066 = vmatprep.mubr.f32.mxu0 %v659_v3 }
 0x174   : > { %v663_v5 = vpop.f32.mrf.mxu1  ;;  %1067 = vmatmul.mubr.f32.vlgmr.msra.gmra.mxu0 %v657_v2 }
 0x175   : > { %1570 = vmatpush3.msra.mxu0 %v1178_v1 }
 0x176   : > { %v665_v7 = vpop.f32.mrf.mxu1  ;;  %1571 = vmatprep.subr.mxu0 %v1177_v4 }
 0x177   : > { %1071 = vmatprep.mubr.f32.mxu0 %v665_v7  ;;  %1572 = vmatpush3.msra.mxu0 %v1177_v4 }
 0x178   : > { %1072 = vmatmul.mubr.f32.gmra.mxu0 %v663_v5  ;;  %1573 = vmatprep.subr.mxu0 %v1176_v6 }
 0x179   : > { %1574 = vmatpush3.msra.mxu0 %v1176_v6 }
 0x17a   : > { %1575 = vmatprep.subr.mxu0 %v1175_v11 }
 0x17b   : > { %1576 = vmatpush3.msra.mxu0 %v1175_v11 }
 0x17c   : > { %v734_v8 = vpop.f32.mrf.mxu1  ;;  %1577 = vmatprep.subr.mxu0 %v1174_v12 }
 0x17d   : > { %1578 = vmatpush3.msra.mxu0 %v1174_v12 }
 0x17e   : > { %v736_v9 = vpop.f32.mrf.mxu1  ;;  %1579 = vmatprep.subr.mxu0 %v1173_v13 }
 0x17f   : > { %1141 = vmatprep.mubr.f32.mxu1 %v736_v9  ;;  %1580 = vmatpush3.msra.mxu0 %v1173_v13 }
 0x180   : > { %v740_v10 = vpop.f32.mrf.mxu1  ;;  %1142 = vmatmul.mubr.f32.vlgmr.msra.gmra.mxu1 %v734_v8  ;;  %1581 = vmatprep.subr.mxu0 %v1172_v14 }
 0x181   : > { %1582 = vmatpush3.msra.mxu0 %v1172_v14 }
 0x182   : > { %v742_v48 = vpop.f32.mrf.mxu1  ;;  %1583 = vmatprep.subr.mxu0 %v1171_v15 }
 0x183   : > { %1146 = vmatprep.mubr.f32.mxu1 %v742_v48  ;;  %1584 = vmatpush3.msra.mxu0 %v1171_v15 }
 0x184   : > { %1147 = vmatmul.mubr.f32.gmra.mxu1 %v740_v10  ;;  %1585 = vmatprep.subr.mxu0 %v1170_v16 }
 0x185   : > { %1586 = vmatpush3.msra.mxu0 %v1170_v16 }
 0x186   : > { %1587 = vmatprep.subr.mxu0 %v1169_v17 }
 0x187   : > { %1588 = vmatpush3.msra.mxu0 %v1169_v17 }
 0x188   : > { %1589 = vmatprep.subr.mxu0 %v1168_v18 }
 0x189   : > { %1590 = vmatpush3.msra.mxu0 %v1168_v18 }
 0x18a   : > { %1591 = vmatprep.subr.mxu0 %v1167_v19 }
 0x18b   : > { %1592 = vmatpush3.msra.mxu0 %v1167_v19 }
 0x18c   : > { %1593 = vmatprep.subr.mxu0 %v1166_v20 }
 0x18d   : > { %1594 = vmatpush3.msra.mxu0 %v1166_v20 }
 0x18e   : > { %1595 = vmatprep.subr.mxu0 %v1165_v21 }
 0x18f   : > { %1596 = vmatpush3.msra.mxu0 %v1165_v21 }
 0x190   : > { %1597 = vmatprep.subr.mxu0 %v1164_v22 }
 0x191   : > { %1598 = vmatpush3.msra.mxu0 %v1164_v22 }
 0x192   : > { %1599 = vmatprep.subr.mxu0 %v1163_v23 }
 0x193   : > { %1600 = vmatpush3.msra.mxu0 %v1163_v23 }
 0x1b5   : > { %v1568_v26 = vpop.f32.mrf.mxu1 }
 0x1b7   : > { %v993_v28 = vpop.f32.mrf.mxu1 }
 0x234   : > { %v1437_v24 = vpop.f32.mrf.mxu0 }
 0x236   : > { %v1438_v25 = vpop.f32.mrf.mxu0 }
 0x237   : > { %v1439_v29 = vadd.f32 %v1438_v25, %v1437_v24 }
 0x238   : > { %v1440_v27 = vpop.f32.mrf.mxu0 }
 0x239   : > { %v1069_v33 = vadd.f32 %v1439_v29, %v993_v28 }
 0x23a   : > { %v1441_v30 = vpop.f32.mrf.mxu0 }
 0x23b   : > { %v1442_v34 = vadd.f32 %v1441_v30, %v1440_v27 }
 0x23d   : > { %v1074_v40 = vadd.f32 %v1568_v26, %v1442_v34 }
 0x240   : > { %v1475_v31 = vpop.f32.mrf.mxu1 }
 0x242   : > { %v1476_v32 = vpop.f32.mrf.mxu1 }
 0x243   : > { %v1477_v35 = vadd.f32 %v1476_v32, %v1475_v31 }
 0x244   : > { %v1478_v36 = vpop.f32.mrf.mxu1 }
 0x245   : > { %v1144_v38 = vadd.f32 %v1477_v35, %v1069_v33 }
 0x246   : > { %v1479_v39 = vpop.f32.mrf.mxu1 }
 0x247   : > { %v1480_v41 = vadd.f32 %v1479_v39, %v1478_v36  ;;  %v1159_v42 = vadd.f32 %v1364_v37, %v1144_v38 }
 0x249   : > { %v1149_v43 = vadd.f32 %v1480_v41, %v1074_v40  ;;  %v1161_v44 = vmax.f32 %v1159_v42, 0.0 }
 0x24b   : > { %v1160_v45 = vadd.f32 %v1364_v37, %v1149_v43  ;;  %1601 = vmatprep.mubr.f32.mxu0 %v1161_v44 }
 0x24d   : > { %v1162_v46 = vmax.f32 %v1160_v45, 0.0 }
 0x24f   : > { %1602 = vmatmul.mubr.f32.vlgmr.msra.gmra.mxu0 %v1162_v46 }
 0x30f   : > { %v1603_v49 = vpop.f32.mrf.mxu0 }
 0x310   : > { %v1258_v50 = vadd.f32 %v1603_v49, %v1365_v47 }
 0x311   : > { %v1252_v51 = vpop.f32.mrf.mxu0 }
 0x312   : > { %v1253_v52 = vadd.f32 %v1365_v47, %v1252_v51 }
 0x314   : > { %1629 = vtanh.f32 %v1253_v52 }
 0x315   : > { %1631 = vtanh.f32 %v1258_v50 }
 0x321   : > { %v1630_v53 = vpop.eup %1629 }
 0x322   : > { %v1632_v54 = vpop.eup %1631  ;;  %1263 = vst [vmem:[%s441_s17] sm:$0xff] %v1630_v53 }
 0x323   : > { %1264 = vst [vmem:[%s441_s17 + $0x8] sm:$0xff] %v1632_v54 }
 0x324 PF: > { %s21_s19 = sadd.s32 1, %s1655_s19   ;;  %s2208_s17 = smov %s1651_s18 }
 0x325   : > { %p18_p6 = scmp.ge.s32.totalorder %s21_s19, 4   ;;  %s2209_s18 = smov %s2211_s20 }
 0x327   :  { %20 = sbr.rel (!%p18_p6) target bundleno = 2 (0x2), region = 105 }

</bundles_post_ra>
